<compile_context>
chip_gen: v5e
topology: v5e:2x2
jax: 0.10.0
libtpu: 0.0.40
codegen_flags: <defaults>
</compile_context>

<pallas_src>
import functools

import jax
import jax.numpy as jnp
from jax.experimental import pallas as pl
from jax.experimental.pallas import tpu as pltpu


# ----------------------------------------------------------------------------
# Parameter glue: Rodrigues formula (pytorch3d.so3_exponential_map equivalent)
# ----------------------------------------------------------------------------
def so3_exponential_map(log_rot, eps=1e-4):
    # log_rot: (H, 3) float32 -> (H, 3, 3) rotation matrices
    nrms = jnp.sum(log_rot * log_rot, axis=1)
    rot_angles = jnp.sqrt(jnp.clip(nrms, eps))
    rai = 1.0 / rot_angles
    fac1 = rai * jnp.sin(rot_angles)
    fac2 = rai * rai * (1.0 - jnp.cos(rot_angles))

    x, y, z = log_rot[:, 0], log_rot[:, 1], log_rot[:, 2]
    zeros = jnp.zeros_like(x)
    skews = jnp.stack(
        [
            jnp.stack([zeros, -z, y], axis=-1),
            jnp.stack([z, zeros, -x], axis=-1),
            jnp.stack([-y, x, zeros], axis=-1),
        ],
        axis=-2,
    )  # (H, 3, 3)
    skews_sq = jnp.einsum("hij,hjk->hik", skews, skews)
    eye = jnp.eye(3, dtype=log_rot.dtype)[None]
    return fac1[:, None, None] * skews + fac2[:, None, None] * skews_sq + eye


# ----------------------------------------------------------------------------
# Pallas kernel: fused 2x3 affine over vreg-dense (rows, 128) point slabs
# ----------------------------------------------------------------------------
def _plane_transformer_kernel(params_ref, pcd_ref, out_ref, *, num_heads):
    # params_ref: (H*8,) f32 SMEM -- per-head [A00,A01,A02, A10,A11,A12, b0, b1]
    # pcd_ref:    (3, row_tile, 128) VMEM in the caller's dtype -- x/y/z slabs
    # out_ref:    (2, row_tile, 128) VMEM in the caller's dtype
    h = pl.program_id(0) % num_heads           # flattened grid axis 0 is b*H + h
    base = 8 * h
    # per-vreg up-cast to f32 (free for f32 callers, keeps bf16 HBM traffic halved)
    x0 = pcd_ref[0].astype(jnp.float32)
    x1 = pcd_ref[1].astype(jnp.float32)
    x2 = pcd_ref[2].astype(jnp.float32)
    for n in range(2):                         # static unroll: 2 output planes
        a0 = params_ref[base + 3 * n + 0]
        a1 = params_ref[base + 3 * n + 1]
        a2 = params_ref[base + 3 * n + 2]
        bn = params_ref[base + 6 + n]
        out_ref[n] = (a0 * x0 + a1 * x1 + a2 * x2 + bn).astype(out_ref.dtype)


def _round_up(x, m):
    return (x + m - 1) // m * m


def _cdiv(a, b):
    return -(-a // b)


def _chip_tiling(itemsize):
    """Per-generation (row_cap, vmem_limit_bytes).

    Block per step = 5 * row_tile * 128 * itemsize bytes (3 in + 2 out channels),
    double-buffered by the pipeline.  Defaults are safe under every chip's scoped
    VMEM default; detected chips get MiB-to-tens-of-MiB blocks.
    """
    row_cap, vmem_limit = 2048, None           # ~10 MiB f32 double-buffered: always safe
    vmem_cap = None
    try:
        info = pltpu.get_tpu_info()
        vmem_cap = getattr(info, "vmem_capacity_bytes", None)
    except Exception:
        vmem_cap = None
    if isinstance(vmem_cap, int) and vmem_cap > 0:
        if vmem_cap >= (100 << 20):            # v5e / v6e: 128 MiB physical VMEM
            row_cap, vmem_limit = 8192, 96 << 20   # 20 MiB/step f32, 40 MiB buffered
        else:                                  # v7x: 64 MiB physical VMEM per TC
            row_cap, vmem_limit = 4096, 48 << 20   # 10 MiB/step f32, 20 MiB buffered
    # narrower dtypes move fewer bytes per row: allow proportionally more rows/step
    row_cap *= max(1, 4 // max(itemsize, 1))
    return row_cap, vmem_limit


def plane_transformer(pcd, log_R, shift, scales=None):
    """Pallas implementation of PlaneTransformer.forward.

    pcd:    (B, H, 3, P) float32 / bfloat16
    log_R:  (H, 3)       axis-angle rotation parameters
    shift:  (H, 3)       per-head shift
    scales: (H, 2) or None (None == do_scales=False)
    returns (B, H, 2, P) in pcd.dtype
    """
    B, H, C, P = pcd.shape
    assert C == 3, "PlaneTransformer expects 3 channels (xyz)"
    dtype = pcd.dtype
    itemsize = jnp.dtype(dtype).itemsize

    # ---- fused per-head affine coefficients (tiny HxNx3 math, plain JAX) ----
    R = so3_exponential_map(log_R.astype(jnp.float32))            # (H, 3, 3), R[h, c, n]
    if scales is None:
        scales_f = jnp.ones((H, 2), dtype=jnp.float32)            # do_scales=False path
    else:
        scales_f = scales.astype(jnp.float32)
    A = scales_f[:, :, None] * jnp.transpose(R, (0, 2, 1))[:, :2, :]          # (H, 2, 3)
    bias = scales_f * jnp.einsum("hc,hcn->hn", shift.astype(jnp.float32), R)[:, :2]
    params = jnp.concatenate([A.reshape(H, 6), bias], axis=1).reshape(-1)     # (H*8,)
    params = params.astype(jnp.float32)                                       # 1-D SMEM

    # ---- point tiling: (rows, 128) lane/sublane-dense slabs, ragged rows masked ----
    # TODO(synk): P not divisible by 128 still pays one wrapper-side pad+slice HBM
    # round trip (the (rows,128) reshape needs 128-aligned P); arrange callers to
    # provide 128-aligned point counts for full bandwidth.
    sub = 8 if itemsize >= 4 else (16 if itemsize == 2 else 32)   # sublane packing
    P_pad = _round_up(P, 128)
    rows_total = P_pad // 128
    row_cap, vmem_limit = _chip_tiling(itemsize)

    total_bh = B * H
    # ensure >= ~4 total grid steps so both v7x TensorCores get balanced work
    needed_row_blocks = max(1, _cdiv(4, total_bh))
    n_row_blocks = max(needed_row_blocks, _cdiv(rows_total, row_cap))
    row_tile = _cdiv(rows_total, n_row_blocks)
    row_tile = min(_round_up(row_tile, sub), rows_total)          # mult of sub, or full
    n_row_blocks = _cdiv(rows_total, row_tile)                    # ragged last block OK

    x = pcd
    if P_pad != P:
        x = jnp.pad(x, ((0, 0), (0, 0), (0, 0), (0, P_pad - P)))
    x = x.reshape(B * H, 3, rows_total, 128)   # free reshape: P is the contiguous dim

    grid = (total_bh, n_row_blocks)
    kernel = functools.partial(_plane_transformer_kernel, num_heads=H)

    compiler_kwargs = dict(dimension_semantics=("parallel", "parallel"))
    if vmem_limit is not None:
        compiler_kwargs["vmem_limit_bytes"] = vmem_limit

    out = pl.pallas_call(
        kernel,
        out_shape=jax.ShapeDtypeStruct((total_bh, 2, rows_total, 128), dtype),
        grid_spec=pltpu.PrefetchScalarGridSpec(
            num_scalar_prefetch=0,
            grid=grid,
            in_specs=[
                # flat (H*8,) fused-coefficient table lives in SMEM
                pl.BlockSpec(memory_space=pltpu.MemorySpace.SMEM),
                # xyz point slabs: (3, row_tile, 128) per step, native dtype
                pl.BlockSpec((None, 3, row_tile, 128), lambda bh, r: (bh, 0, r, 0)),
            ],
            out_specs=pl.BlockSpec((None, 2, row_tile, 128),
                                   lambda bh, r: (bh, 0, r, 0)),
        ),
        compiler_params=pltpu.CompilerParams(**compiler_kwargs),
        cost_estimate=pl.CostEstimate(
            flops=12 * B * H * P_pad,
            transcendentals=0,
            bytes_accessed=5 * B * H * P_pad * itemsize + params.size * 4),
    )(params, x)

    out = out.reshape(B, H, 2, P_pad)
    if P_pad != P:
        out = out[..., :P]
    return out


# ----------------------------------------------------------------------------
# Pure-JAX reference (mirrors the PyTorch forward exactly)
# ----------------------------------------------------------------------------
def plane_transformer_ref(pcd, log_R, shift, scales=None):
    R = so3_exponential_map(log_R)                          # (H, 3, 3)
    x = pcd + shift[None, :, :, None]
    y = jnp.einsum("bhcp,hcn->bhnp", x, R)
    y = y[:, :, :2]
    if scales is not None:
        y = y * scales[None, :, :, None]
    return y


if __name__ == "__main__":
    key = jax.random.PRNGKey(0)
    k1, k2, k3, k4 = jax.random.split(key, 4)

    B, H, P = 2, 4, 256   # small demo shapes; P a multiple of the 128-lane width
    pcd = jax.random.normal(k1, (B, H, 3, P), dtype=jnp.float32)

    # Deterministic parameter init (shapes per module __init__: log_R (H,3),
    # shift (H,3), scales (H,2)); nonzero values so every broadcast is exercised.
    log_R = jax.random.normal(k2, (H, 3), dtype=jnp.float32)
    shift = 0.1 * jax.random.normal(k3, (H, 3), dtype=jnp.float32)
    scales = 1.0 + 0.1 * jax.random.normal(k4, (H, 2), dtype=jnp.float32)

    # 1) do_scales=True path (f32)
    out = jax.block_until_ready(plane_transformer(pcd, log_R, shift, scales))
    ref = plane_transformer_ref(pcd, log_R, shift, scales)
    assert out.shape == (B, H, 2, P)
    assert out.dtype == pcd.dtype
    assert jnp.allclose(out, ref, atol=1e-5, rtol=1e-5)

    # 2) do_scales=False path (identity scales fused into the affine)
    out_ns = jax.block_until_ready(plane_transformer(pcd, log_R, shift, None))
    ref_ns = plane_transformer_ref(pcd, log_R, shift, None)
    assert jnp.allclose(out_ns, ref_ns, atol=1e-5, rtol=1e-5)

    # 3) native bf16 I/O path (streams bf16, computes f32 in-kernel, stores bf16)
    pcd_bf16 = pcd.astype(jnp.bfloat16)
    out_bf = jax.block_until_ready(plane_transformer(pcd_bf16, log_R, shift, scales))
    ref_bf = plane_transformer_ref(pcd_bf16.astype(jnp.float32), log_R, shift, scales)
    assert out_bf.dtype == jnp.bfloat16
    assert jnp.allclose(out_bf.astype(jnp.float32), ref_bf, atol=2e-2, rtol=2e-2)

    # 4) non-128-aligned P (pad+slice fallback path)
    P2 = 200
    pcd2 = jax.random.normal(k1, (B, H, 3, P2), dtype=jnp.float32)
    out2 = jax.block_until_ready(plane_transformer(pcd2, log_R, shift, scales))
    ref2 = plane_transformer_ref(pcd2, log_R, shift, scales)
    assert out2.shape == (B, H, 2, P2)
    assert jnp.allclose(out2, ref2, atol=1e-5, rtol=1e-5)

    # 5) small B*H with forced row-split and a ragged (masked) last row block
    pcd3 = jax.random.normal(k2, (1, 1, 3, 12 * 128), dtype=jnp.float32)
    out3 = jax.block_until_ready(
        plane_transformer(pcd3, log_R[:1], shift[:1], scales[:1]))
    ref3 = plane_transformer_ref(pcd3, log_R[:1], shift[:1], scales[:1])
    assert jnp.allclose(out3, ref3, atol=1e-5, rtol=1e-5)

    print("KERNEL_OK")
</pallas_src>

<mosaic_0001>
module attributes {stable_mosaic.version = 11 : i64} {
  func.func @_plane_transformer_kernel(%arg0: i32, %arg1: i32, %arg2: memref<32xf32, #tpu.memory_space<smem>>, %arg3: memref<1x3x2x128xf32, #tpu.memory_space<vmem>>, %arg4: memref<1x2x2x128xf32, #tpu.memory_space<vmem>>) attributes {dimension_semantics = [#tpu.dimension_semantics<parallel>, #tpu.dimension_semantics<parallel>], iteration_bounds = array<i64: 8, 1>, scalar_prefetch = 0 : i64, scratch_operands = 0 : i64, tpu.core_type = #tpu.core_type<tc>, window_params = [{transform_indices = @transform_0, window_bounds = array<i64: 32>}, {transform_indices = @transform_1, window_bounds = array<i64: 1, 3, 2, 128>}, {transform_indices = @transform_2, window_bounds = array<i64: 1, 2, 2, 128>}]} {
    %c4_i32 = arith.constant 4 : i32
    %c0_i32 = arith.constant 0 : i32
    %0 = arith.cmpi eq, %c4_i32, %c0_i32 : i32
    %c1_i32 = arith.constant 1 : i32
    %1 = arith.select %0, %c1_i32, %c4_i32 : i32
    %2 = arith.remsi %arg0, %1 : i32
    %c0_i32_0 = arith.constant 0 : i32
    %3 = arith.cmpi ne, %2, %c0_i32_0 : i32
    %c0_i32_1 = arith.constant 0 : i32
    %4 = arith.cmpi slt, %2, %c0_i32_1 : i32
    %c0_i32_2 = arith.constant 0 : i32
    %5 = arith.cmpi slt, %1, %c0_i32_2 : i32
    %6 = arith.xori %4, %5 : i1
    %7 = arith.andi %6, %3 : i1
    %8 = arith.addi %2, %1 : i32
    %9 = arith.select %7, %8, %2 : i32
    %c8_i32 = arith.constant 8 : i32
    %10 = arith.muli %c8_i32, %9 : i32
    %c0 = arith.constant 0 : index
    %c0_3 = arith.constant 0 : index
    %c0_4 = arith.constant 0 : index
    %c0_5 = arith.constant 0 : index
    %11 = vector.load %arg3[%c0, %c0_3, %c0_4, %c0_5] : memref<1x3x2x128xf32, #tpu.memory_space<vmem>>, vector<1x1x2x128xf32>
    %12 = vector.shape_cast %11 : vector<1x1x2x128xf32> to vector<2x128xf32>
    %c0_6 = arith.constant 0 : index
    %c1 = arith.constant 1 : index
    %c0_7 = arith.constant 0 : index
    %c0_8 = arith.constant 0 : index
    %13 = vector.load %arg3[%c0_6, %c1, %c0_7, %c0_8] : memref<1x3x2x128xf32, #tpu.memory_space<vmem>>, vector<1x1x2x128xf32>
    %14 = vector.shape_cast %13 : vector<1x1x2x128xf32> to vector<2x128xf32>
    %c0_9 = arith.constant 0 : index
    %c2 = arith.constant 2 : index
    %c0_10 = arith.constant 0 : index
    %c0_11 = arith.constant 0 : index
    %15 = vector.load %arg3[%c0_9, %c2, %c0_10, %c0_11] : memref<1x3x2x128xf32, #tpu.memory_space<vmem>>, vector<1x1x2x128xf32>
    %16 = vector.shape_cast %15 : vector<1x1x2x128xf32> to vector<2x128xf32>
    %c0_i32_12 = arith.constant 0 : i32
    %17 = arith.addi %10, %c0_i32_12 : i32
    %c0_i32_13 = arith.constant 0 : i32
    %18 = arith.addi %17, %c0_i32_13 : i32
    %19 = arith.index_cast %18 : i32 to index
    %20 = memref.load %arg2[%19] : memref<32xf32, #tpu.memory_space<smem>>
    %c0_i32_14 = arith.constant 0 : i32
    %21 = arith.addi %10, %c0_i32_14 : i32
    %c1_i32_15 = arith.constant 1 : i32
    %22 = arith.addi %21, %c1_i32_15 : i32
    %23 = arith.index_cast %22 : i32 to index
    %24 = memref.load %arg2[%23] : memref<32xf32, #tpu.memory_space<smem>>
    %c0_i32_16 = arith.constant 0 : i32
    %25 = arith.addi %10, %c0_i32_16 : i32
    %c2_i32 = arith.constant 2 : i32
    %26 = arith.addi %25, %c2_i32 : i32
    %27 = arith.index_cast %26 : i32 to index
    %28 = memref.load %arg2[%27] : memref<32xf32, #tpu.memory_space<smem>>
    %c6_i32 = arith.constant 6 : i32
    %29 = arith.addi %10, %c6_i32 : i32
    %c0_i32_17 = arith.constant 0 : i32
    %30 = arith.addi %29, %c0_i32_17 : i32
    %31 = arith.index_cast %30 : i32 to index
    %32 = memref.load %arg2[%31] : memref<32xf32, #tpu.memory_space<smem>>
    %33 = vector.broadcast %20 : f32 to vector<2x128xf32>
    %34 = arith.mulf %33, %12 : vector<2x128xf32>
    %35 = vector.broadcast %24 : f32 to vector<2x128xf32>
    %36 = arith.mulf %35, %14 : vector<2x128xf32>
    %37 = arith.addf %34, %36 : vector<2x128xf32>
    %38 = vector.broadcast %28 : f32 to vector<2x128xf32>
    %39 = arith.mulf %38, %16 : vector<2x128xf32>
    %40 = arith.addf %37, %39 : vector<2x128xf32>
    %41 = vector.broadcast %32 : f32 to vector<2x128xf32>
    %42 = arith.addf %40, %41 : vector<2x128xf32>
    %c0_18 = arith.constant 0 : index
    %c0_19 = arith.constant 0 : index
    %c0_20 = arith.constant 0 : index
    %c0_21 = arith.constant 0 : index
    %43 = vector.load %arg4[%c0_18, %c0_19, %c0_20, %c0_21] : memref<1x2x2x128xf32, #tpu.memory_space<vmem>>, vector<1x1x2x128xf32>
    %44 = vector.shape_cast %43 : vector<1x1x2x128xf32> to vector<2x128xf32>
    %45 = vector.shape_cast %42 : vector<2x128xf32> to vector<1x1x2x128xf32>
    tpu.vector_store %arg4[%c0_18, %c0_19, %c0_20, %c0_21], %45 {strides = array<i32>} : memref<1x2x2x128xf32, #tpu.memory_space<vmem>>, vector<1x1x2x128xf32>,
    %c3_i32 = arith.constant 3 : i32
    %46 = arith.addi %10, %c3_i32 : i32
    %c0_i32_22 = arith.constant 0 : i32
    %47 = arith.addi %46, %c0_i32_22 : i32
    %48 = arith.index_cast %47 : i32 to index
    %49 = memref.load %arg2[%48] : memref<32xf32, #tpu.memory_space<smem>>
    %c3_i32_23 = arith.constant 3 : i32
    %50 = arith.addi %10, %c3_i32_23 : i32
    %c1_i32_24 = arith.constant 1 : i32
    %51 = arith.addi %50, %c1_i32_24 : i32
    %52 = arith.index_cast %51 : i32 to index
    %53 = memref.load %arg2[%52] : memref<32xf32, #tpu.memory_space<smem>>
    %c3_i32_25 = arith.constant 3 : i32
    %54 = arith.addi %10, %c3_i32_25 : i32
    %c2_i32_26 = arith.constant 2 : i32
    %55 = arith.addi %54, %c2_i32_26 : i32
    %56 = arith.index_cast %55 : i32 to index
    %57 = memref.load %arg2[%56] : memref<32xf32, #tpu.memory_space<smem>>
    %c6_i32_27 = arith.constant 6 : i32
    %58 = arith.addi %10, %c6_i32_27 : i32
    %c1_i32_28 = arith.constant 1 : i32
    %59 = arith.addi %58, %c1_i32_28 : i32
    %60 = arith.index_cast %59 : i32 to index
    %61 = memref.load %arg2[%60] : memref<32xf32, #tpu.memory_space<smem>>
    %62 = vector.broadcast %49 : f32 to vector<2x128xf32>
    %63 = arith.mulf %62, %12 : vector<2x128xf32>
    %64 = vector.broadcast %53 : f32 to vector<2x128xf32>
    %65 = arith.mulf %64, %14 : vector<2x128xf32>
    %66 = arith.addf %63, %65 : vector<2x128xf32>
    %67 = vector.broadcast %57 : f32 to vector<2x128xf32>
    %68 = arith.mulf %67, %16 : vector<2x128xf32>
    %69 = arith.addf %66, %68 : vector<2x128xf32>
    %70 = vector.broadcast %61 : f32 to vector<2x128xf32>
    %71 = arith.addf %69, %70 : vector<2x128xf32>
    %c0_29 = arith.constant 0 : index
    %c1_30 = arith.constant 1 : index
    %c0_31 = arith.constant 0 : index
    %c0_32 = arith.constant 0 : index
    %72 = vector.load %arg4[%c0_29, %c1_30, %c0_31, %c0_32] : memref<1x2x2x128xf32, #tpu.memory_space<vmem>>, vector<1x1x2x128xf32>
    %73 = vector.shape_cast %72 : vector<1x1x2x128xf32> to vector<2x128xf32>
    %74 = vector.shape_cast %71 : vector<2x128xf32> to vector<1x1x2x128xf32>
    tpu.vector_store %arg4[%c0_29, %c1_30, %c0_31, %c0_32], %74 {strides = array<i32>} : memref<1x2x2x128xf32, #tpu.memory_space<vmem>>, vector<1x1x2x128xf32>,
    return
  }
  func.func @transform_0(%arg0: i32, %arg1: i32) -> i32 {
    %c0_i32 = arith.constant 0 : i32
    %c0_i32_0 = arith.constant 0 : i32
    return %c0_i32 : i32
  }
  func.func @transform_1(%arg0: i32, %arg1: i32) -> (i32, i32, i32, i32) {
    %c0_i32 = arith.constant 0 : i32
    %c0_i32_0 = arith.constant 0 : i32
    %c0_i32_1 = arith.constant 0 : i32
    return %arg0, %c0_i32, %arg1, %c0_i32_0 : i32, i32, i32, i32
  }
  func.func @transform_2(%arg0: i32, %arg1: i32) -> (i32, i32, i32, i32) {
    %c0_i32 = arith.constant 0 : i32
    %c0_i32_0 = arith.constant 0 : i32
    %c0_i32_1 = arith.constant 0 : i32
    return %arg0, %c0_i32, %arg1, %c0_i32_0 : i32, i32, i32, i32
  }
}

</mosaic_0001>

<bundles_post_ra>
// kernel: tpu_custom_call.1
= control target key start
LH: loop header
LB: loop body
LE: loop exit
PB: predicated region body
PF: predicated region fallthrough
CT: control target
= control target key end

     0   :  { %7 = vsyncpa [#allocation5], 0  ;;  %s770_s0 = inlined_call_operand.hbm [shape: f32[32], index: 0, kind: input, shape index: {}]   ;;  %s771_s1 = inlined_call_operand.hbm [shape: f32[8,3,2,128], index: 1, kind: input, shape index: {}]   ;;  %s772_s2 = inlined_call_operand.hbm [shape: f32[8,2,2,128], index: 2, kind: output, shape index: {}]  }
   0x1   :  { %8 = vsyncpa [#allocation3], 0 }
   0x2   :  { %10 = vsyncpa [#allocation3 + $0x1], 0 }
   0x3   :  { %11 = vsyncpa [#allocation4], 0 }
   0x4   :  { %13 = vsyncpa [#allocation4 + $0x1], 0  ;;  %s620_s9 = smov 0   ;;  %s622_s10 = smov 0  }
   0x5   :  { %s624_s11 = smov 0   ;;  %s626_s12 = smov 0  }
   0x6   :  { %s628_s13 = smov 0   ;;  %s630_s14 = smov 0  }
   0x7 LB: > { %s365_s15 = sadd.s32 4294967295, %s598_s14   ;;  %s366_s16 = sadd.s32 4294967294, %s598_s14   ;;  %s598_s14 = sphi %s630_s14, %s19_s14   ;;  %s594_s13 = sphi %s628_s13, %s783_s13   ;;  %s590_s12 = sphi %s626_s12, %s782_s12   ;;  %s586_s11 = sphi %s624_s11, %s781_s11   ;;  %s582_s10 = sphi %s622_s10, %s780_s10   ;;  %s578_s9 = sphi %s620_s9, %s779_s9  }
   0x8   : > { %s61_s17 = sadd.s32 1, %s586_s11  ;;  %p68_p0 = scmp.ne.s32.totalorder %s586_s11, %s582_s10 }
   0x9   : > { %p69_p1 = scmp.eq.s32.totalorder %s598_s14, 0  ;;  %p74_p2 = scmp.ne.s32.totalorder %s582_s10, %s578_s9 }
   0xa   : > { %p658_p3 = scmp.eq.s32.totalorder %s365_s15, 0  ;;  %p100_p4 = scmp.eq.s32.totalorder %s365_s15, 7 }
   0xb   : > { %p70_p5 = por %p69_p1, %p68_p0  ;;  %p106_p6 = scmp.eq.s32.totalorder %s366_s16, 7 }
   0xc   : > { %p664_p7 = por %p658_p3, %p74_p2  ;;  %p668_p8 = por %p100_p4, %p68_p0 }
   0xd   : > { %p672_p9 = por %p106_p6, %p74_p2  ;;  %p367_p10 = scmp.ge.s32.totalorder %s598_s14, 1 }
   0xe   : > { %p113_p11 = scmp.lt.s32.totalorder %s598_s14, 9  ;;  %s125_s24 = sshll.u32 %s770_s0, 4  ;;  %s126_s24 = int_to_ptr.hbm [resolvable:$true] %s125_s24 }
   0xf   : > { %p411_p13 = scmp.lt.s32.totalorder %s598_s14, 8  ;;  %s31_s27 = sadd.s32 1, %s594_s13 }
  0x10   : > { %p681_p12 = pnand %p367_p10, %p113_p11  ;;  %p33_p4 = scmp.ge.s32.totalorder %s31_s27, 8 }
  0x11   : > { %p688_p1 = pnand %p411_p13, %p70_p5  ;;  %s136_s28 = sand.u32 1, %s586_s11  }
  0x12   : > { %p398_p0 = pneg %p681_p12  ;;  %s600_s29 = smov [#allocation2]  }
  0x13   : > { %s785_s27 = smov (%p33_p4, %s31_s27), 0  ;;  %s387_s30 = smul.u32 6, %s136_s28 }
  0x14   : > { %p399_p2 = pnand %p398_p0, %p658_p3  ;;  %s56_s3 = ssub.s32 %s594_s13, %s785_s27 }
  0x15   : > { %s388_s4 = smul.u32 6, %s594_s13  ;;  %p59_p6 = scmp.eq.s32.totalorder %s56_s3, 0 }
  0x16   : > { %401 = dma.hbm_to_smem (!%p399_p2), %s126_s24, 16, %s600_s29, [#allocation5]  }
  0x17   : > { %s146_s7 = scalar_lea.hbm %s771_s1, %s388_s4  ;;  %s140_s8 = scalar_lea.vmem [#allocation6], %s387_s30 }
  0x18   : > { %s149_s15 = sshll.u32 %s140_s8, 4  ;;  %s147_s22 = sshll.u32 %s146_s7, 4  ;;  %s150_s15 = int_to_ptr.vmem [resolvable:$true] %s149_s15  ;;  %s148_s22 = int_to_ptr.hbm [resolvable:$true] %s147_s22 }
  0x19   : > { %s707_s16 = scalar_select %p59_p6, %s586_s11, %s61_s17  }
  0x1a   : > { %s137_s23 = scalar_lea.sflag [#allocation3], %s136_s28  ;;  %s601_s24 = smov 32  }
  0x1b   : > { %s602_s29 = smov 2   ;;  %161 = sbr.rel (%p681_p12) target bundleno = 73 (0x49), region = 28 }
  0x1c   : > { %405 = dma.hbm_to_vmem [thread:$0]  (!%p688_p1), %s148_s22, 96, %s150_s15, %s137_s23, %s601_s24, %s601_s24, %s602_s29  }
  0x20   : > { %565 = dma.done.wait (%p658_p3), [#allocation5], 16  }
  0x21   : > { %567 = vsyncadd (%p658_p3), [#allocation5], 4294967280  ;;  %s718_s17 = sand.u32 1, %s582_s10  }
  0x22   : > { %s389_s28 = smul.u32 6, %s718_s17  ;;  %s169_s30 = scalar_lea.sflag [#allocation3], %s718_s17 }
  0x24   : > { %s172_s3 = scalar_lea.vmem [#allocation6], %s389_s28 }
  0x25   : > { %569 = dma.done.wait (%p664_p7), %s169_s30, 96  }
  0x26   : > { %571 = vsyncadd (%p664_p7), %s169_s30, 4294967200 }
  0x27   : > { %178 = sfence }
  0x28   : > { %p195_p5 = scmp.lt.s32.totalorder %s590_s12, 0  ;;  %s196_s18 = ssub.s32 0, %s590_s12  ;;  %v208_v0 = vld [vmem:[%s172_s3] sm:$0x3]  ;;  %v378_v1 = vld [vmem:[%s172_s3 + $0x2] sm:$0x3] }
  0x29   : > { %s374_s25 = smin.u32 %s590_s12, %s196_s18  ;;  %v379_v2 = vld [vmem:[%s172_s3 + $0x4] sm:$0x3] }
  0x2a   : > { %s198_s26 = sand.u32 3, %s374_s25  }
  0x2b   : > { %s199_s4 = ssub.s32 0, %s198_s26 }
  0x2c   : > { %s787_s4 = smov (!%p195_p5, %s199_s4), %s198_s26 }
  0x2d   : > { %p376_p3 = scmp.lt.s32.totalorder %s787_s4, 0  ;;  %s205_s5 = sadd.s32 4, %s787_s4 }
  0x2f   : > { %s789_s5 = smov (!%p376_p3, %s205_s5), %s787_s4 }
  0x30   : > { %s377_s6 = sshll.u32 %s789_s5, 3  ;;  %s373_s5 = sshll.u32 %s718_s17, 2 }
  0x31   : > { %s213_s7 = sld [smem:[#allocation2 + %s377_s6]]  ;;  %s214_s8 = sadd.s32 1, %s377_s6 }
  0x32   : > { %s215_s15 = sld [smem:[#allocation2 + %s214_s8]]  ;;  %s216_s19 = sadd.s32 2, %s377_s6 }
  0x33   : > { %s217_s22 = sld [smem:[#allocation2 + %s216_s19]]  ;;  %s218_s23 = sadd.s32 6, %s377_s6 }
  0x34   : > { %s729_s24 = sld [smem:[#allocation2 + %s218_s23]]  ;;  %s231_s29 = sadd.s32 3, %s377_s6 }
  0x35   : > { %s232_s28 = sld [smem:[#allocation2 + %s231_s29]]  ;;  %s233_s30 = sadd.s32 4, %s377_s6 }
  0x36   : > { %s234_s18 = sld [smem:[#allocation2 + %s233_s30]]  ;;  %s235_s25 = sadd.s32 5, %s377_s6 }
  0x37   : > { %v220_v3 = vstv %s213_s7  ;;  %s236_s26 = sld [smem:[#allocation2 + %s235_s25]]  ;;  %s237_s4 = sadd.s32 7, %s377_s6 }
  0x38   : > { %v221_v4 = vmul.f32 %v220_v3, %v208_v0  ;;  %v222_v5 = vstv %s215_s15  ;;  %s238_s8 = sld [smem:[#allocation2 + %s237_s4]]  ;;  %s386_s19 = sshll.u32 %s590_s12, 2 }
  0x39   : > { %v223_v6 = vmul.f32 %v378_v1, %v222_v5  ;;  %v225_v7 = vstv %s217_s22  ;;  %s264_s6 = scalar_lea.hbm %s772_s2, %s386_s19  ;;  %s194_s23 = scalar_lea.vmem [#allocation7], %s373_s5 }
  0x3a   : > { %v226_v8 = vmul.f32 %v379_v2, %v225_v7  ;;  %v228_v11 = vstv %s729_s24  ;;  %s265_s15 = sshll.u32 %s194_s23, 4  ;;  %s267_s12 = sshll.u32 %s264_s6, 4  ;;  %s266_s15 = int_to_ptr.vmem [resolvable:$true] %s265_s15  ;;  %s268_s12 = int_to_ptr.hbm [resolvable:$true] %s267_s12 }
  0x3b   : > { %v224_v9 = vadd.f32 %v223_v6, %v221_v4  ;;  %v239_v10 = vstv %s232_s28  ;;  %s252_s22 = scalar_lea.sflag [#allocation4], %s718_s17  ;;  %s526_s24 = sshra.s32 %s268_s12, 4  ;;  %s527_s24 = int_to_ptr.hbm [resolvable:$true] %s526_s24 }
  0x3c   : > { %v240_v12 = vmul.f32 %v239_v10, %v208_v0  ;;  %v241_v13 = vstv %s234_s18  ;;  %s528_s29 = scalar_lea.hbm %s527_s24, 4  ;;  %s532_s18 = scalar_lea.hbm %s772_s2, 32 }
  0x3d   : > { %v227_v14 = vadd.f32 %v226_v8, %v224_v9  ;;  %v242_v15 = vmul.f32 %v378_v1, %v241_v13  ;;  %v244_v16 = vstv %s236_s26  ;;  %p529_p7 = scmp.ne.s32.totalorder %s527_s24, %s528_s29  ;;  %p533_p12 = scmp.lt.s32.totalorder %s527_s24, %s772_s2 }
  0x3e   : > { %v245_v17 = vmul.f32 %v379_v2, %v244_v16  ;;  %v247_v20 = vstv %s238_s8  ;;  %p534_p13 = scmp.lt.s32.totalorder %s532_s18, %s528_s29 }
  0x3f   : > { %v229_v18 = vadd.f32 %v228_v11, %v227_v14  ;;  %v243_v19 = vadd.f32 %v242_v15, %v240_v12  ;;  %p530_p10 = pnand %p529_p7, %p668_p8 }
  0x40   : > { %p535_p0 = por %p534_p13, %p533_p12 }
  0x41   : > { %230 = vst [vmem:[%s194_s23] sm:$0x3] %v229_v18  ;;  %v246_v21 = vadd.f32 %v245_v17, %v243_v19  ;;  %p531_p11 = pneg %p530_p10 }
  0x43   : > { %v248_v22 = vadd.f32 %v247_v20, %v246_v21  ;;  %p536_p1 = pnand %p535_p0, %p531_p11 }
  0x45   : > { %380 = vst [vmem:[%s194_s23 + $0x2] sm:$0x3] %v248_v22 }
  0x46   : > { %539 = shalt.err (!%p536_p1)
}
  0x47   : > { %s603_s17 = smov 32   ;;  %s604_s4 = smov 2  }
  0x48   : > { %396 = dma.vmem_to_hbm [thread:$0]  (%p668_p8), %s266_s15, 64, %s268_s12, %s252_s22, %s603_s17, %s603_s17, %s604_s4  }
  0x49 PF: > { %p413_p2 = scmp.ge.s32.totalorder %s598_s14, 2  ;;  %s282_s5 = sand.u32 1, %s578_s9  }
  0x4a   : > { %s283_s8 = scalar_lea.sflag [#allocation4], %s282_s5 }
  0x4b   : > { %p407_p4 = pnand %p413_p2, %p672_p9 }
  0x4d   : > { %p408_p6 = pneg %p407_p4 }
  0x4f   : > { %573 = dma.done.wait (%p408_p6), %s283_s8, 64  }
  0x50   : > { %575 = vsyncadd (%p408_p6), %s283_s8, 4294967232  ;;  %s19_s14 = sadd.s32 1, %s598_s14   ;;  %s779_s9 = smov %s582_s10 }
  0x51   : > { %p16_p5 = scmp.ge.s32.totalorder %s19_s14, 10   ;;  %s780_s10 = smov %s586_s11 }
  0x52   : > { %s781_s11 = smov %s707_s16  ;;  %s782_s12 = smov %s594_s13 }
  0x53   : > { %s783_s13 = smov %s785_s27  ;;  %18 = sbr.rel (!%p16_p5) target bundleno = 7 (0x7), region = 81 }
  0x58   :  { %289 = vsyncpa [#allocation3], 1 }
  0x59   :  { %291 = vsyncpa [#allocation3 + $0x1], 1 }
  0x5a   :  { %292 = vsyncpa [#allocation4], 1 }
  0x5b   :  { %294 = vsyncpa [#allocation4 + $0x1], 1 }
  0x5c   :  { %295 = vsyncpa [#allocation5], 1 }
  0x5d   :  { %297 = vsyncpa [#allocation5 + $0x1], 1 }

</bundles_post_ra>
